<compile_context>
chip_gen: v5e
topology: v5e:2x2
jax: 0.10.0
libtpu: 0.0.40
codegen_flags: <defaults>
</compile_context>

<pallas_src>
import functools

import jax
import jax.numpy as jnp
from jax.experimental import pallas as pl
from jax.experimental.pallas import tpu as pltpu

INPUT_BITS = 8  # must be one of [2, 4, 6, 8]


def _round_up(v, m):
    return (v + m - 1) // m * m


# ---------------------------------------------------------------------------
# Pass 1: pre-quantization (mem-bound).
# ---------------------------------------------------------------------------
def _prequant_kernel(scale_ref, x_ref, q_ref, *, thresh, rows, cols):
    """q = clip(round(x * scale), -thresh, thresh), zero-filled padding.

    scale_ref: SMEM f32[1]; x_ref: VMEM (tr, tc) f32 tile (edge blocks may read
    out-of-bounds garbage); q_ref: VMEM (tr, tc) int8/bf16 tile.
    """
    tr, tc = q_ref.shape
    q = jnp.clip(jnp.round(x_ref[...] * scale_ref[0]), -thresh, thresh)
    # Static check: only emit the mask when padding actually exists.
    if rows % tr != 0 or cols % tc != 0:
        i = pl.program_id(0)
        j = pl.program_id(1)
        row_ids = i * tr + jax.lax.broadcasted_iota(jnp.int32, (tr, tc), 0)
        col_ids = j * tc + jax.lax.broadcasted_iota(jnp.int32, (tr, tc), 1)
        keep = (row_ids < rows) & (col_ids < cols)
        q = jnp.where(keep, q, 0.0)  # zero padding is exact; kills OOB garbage/NaN
    q_ref[...] = q.astype(q_ref.dtype)


def _prequantize(x, scale, *, thresh, tile_r, tile_c, out_dtype, vmem_limit):
    rows, cols = x.shape
    rp, cp = _round_up(rows, tile_r), _round_up(cols, tile_c)
    kernel = functools.partial(_prequant_kernel, thresh=thresh, rows=rows, cols=cols)
    return pl.pallas_call(
        kernel,
        out_shape=jax.ShapeDtypeStruct((rp, cp), out_dtype),
        grid_spec=pltpu.PrefetchScalarGridSpec(
            num_scalar_prefetch=0,
            grid=(rp // tile_r, cp // tile_c),
            in_specs=[
                pl.BlockSpec(memory_space=pltpu.MemorySpace.SMEM),    # scale (1,)
                pl.BlockSpec((tile_r, tile_c), lambda i, j: (i, j)),  # f32 tile
            ],
            out_specs=pl.BlockSpec((tile_r, tile_c), lambda i, j: (i, j)),
        ),
        compiler_params=pltpu.CompilerParams(
            dimension_semantics=("parallel", "parallel"),
            vmem_limit_bytes=vmem_limit,
        ),
    )(scale, x)


# ---------------------------------------------------------------------------
# Pass 2: matmul on pre-quantized operands.
# ---------------------------------------------------------------------------
def _matmul_kernel_bf16(inv_ref, x_ref, y_ref, o_ref):
    """bf16 codes -> f32 accumulation directly in the resident output block."""

    @pl.when(pl.program_id(2) == 0)
    def _():
        o_ref[...] = jnp.zeros_like(o_ref)

    o_ref[...] += jnp.dot(x_ref[...], y_ref[...], preferred_element_type=jnp.float32)

    @pl.when(pl.program_id(2) == pl.num_programs(2) - 1)
    def _():
        o_ref[...] = o_ref[...] * inv_ref[0]  # dequant once at the end


def _matmul_kernel_int8(inv_ref, x_ref, y_ref, o_ref, acc_ref):
    """int8 codes -> bit-exact int32 accumulation, rescaled once at the end."""

    @pl.when(pl.program_id(2) == 0)
    def _():
        acc_ref[...] = jnp.zeros_like(acc_ref)

    acc_ref[...] += jnp.dot(x_ref[...], y_ref[...], preferred_element_type=jnp.int32)

    @pl.when(pl.program_id(2) == pl.num_programs(2) - 1)
    def _():
        o_ref[...] = acc_ref[...].astype(jnp.float32) * inv_ref[0]


def _select_operand_dtype():
    """int8 MXU path on v5e/v5p/v6e; bf16 elsewhere (v7x has no int MXU path)."""
    try:
        kind = jax.devices()[0].device_kind.lower()
    except Exception:
        return jnp.bfloat16
    if "v5" in kind or "v6" in kind:
        return jnp.int8
    return jnp.bfloat16


def _quantized_matmul_impl(x, y, x_thresh, y_thresh, *, bits, tm, tn, tk, op_dtype):
    M, K = x.shape
    K2, N = y.shape
    assert K == K2
    thresh = float(2 ** (bits - 1) - 1)

    x_thresh = jnp.reshape(jnp.asarray(x_thresh, jnp.float32), (1,))
    y_thresh = jnp.reshape(jnp.asarray(y_thresh, jnp.float32), (1,))
    x_scale = thresh / x_thresh
    y_scale = thresh / y_thresh
    inv_scale = (1.0 / (x_scale * y_scale)).astype(jnp.float32)

    # Tile sizes: large by default; clamped to the aligned problem size.
    # Sublane granularity 32 covers both int8 (32) and bf16 (16) native tiling.
    tm = max(32, min(tm, _round_up(M, 32)))
    tk = max(128, min(tk, _round_up(K, 128)))
    tn = max(128, min(tn, _round_up(N, 128)))
    Mp, Kp, Np = _round_up(M, tm), _round_up(K, tk), _round_up(N, tn)

    use_int8 = jnp.dtype(op_dtype) == jnp.dtype(jnp.int8)
    isz = jnp.dtype(op_dtype).itemsize

    # Explicit VMEM budget: double-buffered quantized inputs + double-buffered
    # f32 output (+ int32 scratch for the int8 path), plus headroom.  Clamped
    # to v7x's 64 MiB per-TC physical VMEM.
    vmem_need = 2 * (tm * tk + tk * tn) * isz + 2 * tm * tn * 4
    if use_int8:
        vmem_need += tm * tn * 4
    vmem_limit = int(min(max(vmem_need + (16 << 20), 32 << 20), 64 << 20))

    # ---- Pass 1: quantize each operand once (folds the zero padding). -------
    xq = _prequantize(x, x_scale, thresh=thresh, tile_r=tm, tile_c=tk,
                      out_dtype=op_dtype, vmem_limit=vmem_limit)
    yq = _prequantize(y, y_scale, thresh=thresh, tile_r=tk, tile_c=tn,
                      out_dtype=op_dtype, vmem_limit=vmem_limit)

    # ---- Pass 2: tiled matmul. ----------------------------------------------
    grid = (Mp // tm, Np // tn, Kp // tk)
    if use_int8:
        kernel = _matmul_kernel_int8
        scratch = [pltpu.VMEM((tm, tn), jnp.int32)]
    else:
        kernel = _matmul_kernel_bf16
        scratch = []

    flops = 2 * Mp * Np * Kp
    bytes_accessed = (Mp * Kp * isz * (Np // tn)
                      + Kp * Np * isz * (Mp // tm)
                      + Mp * Np * 4)

    out = pl.pallas_call(
        kernel,
        out_shape=jax.ShapeDtypeStruct((Mp, Np), jnp.float32),
        grid_spec=pltpu.PrefetchScalarGridSpec(
            num_scalar_prefetch=0,
            grid=grid,
            in_specs=[
                pl.BlockSpec(memory_space=pltpu.MemorySpace.SMEM),  # inv_scale (1,)
                pl.BlockSpec((tm, tk), lambda i, j, k: (i, k)),     # xq tile
                pl.BlockSpec((tk, tn), lambda i, j, k: (k, j)),     # yq tile
            ],
            out_specs=pl.BlockSpec((tm, tn), lambda i, j, k: (i, j)),
            scratch_shapes=scratch,
        ),
        compiler_params=pltpu.CompilerParams(
            dimension_semantics=("parallel", "parallel", "arbitrary"),
            vmem_limit_bytes=vmem_limit,
        ),
        cost_estimate=pl.CostEstimate(flops=flops, transcendentals=0,
                                      bytes_accessed=bytes_accessed),
    )(inv_scale, xq, yq)

    return out[:M, :N]


def quantized_matmul(x, y, x_thresh, y_thresh, *, bits=INPUT_BITS,
                     tm=512, tn=512, tk=1024, op_dtype=None):
    """x: (M, K) f32, y: (K, N) f32, thresholds: positive f32 of shape (1,)."""
    assert bits in (2, 4, 6, 8)
    if op_dtype is None:
        op_dtype = _select_operand_dtype()
    try:
        out = _quantized_matmul_impl(x, y, x_thresh, y_thresh, bits=bits,
                                     tm=tm, tn=tn, tk=tk, op_dtype=op_dtype)
        return jax.block_until_ready(out)
    except Exception:
        if jnp.dtype(op_dtype) == jnp.dtype(jnp.int8):
            # Safety net: the bf16 MXU path works on every TPU generation.
            out = _quantized_matmul_impl(x, y, x_thresh, y_thresh, bits=bits,
                                         tm=tm, tn=tn, tk=tk,
                                         op_dtype=jnp.bfloat16)
            return jax.block_until_ready(out)
        raise


def _reference(x, y, x_thresh, y_thresh, bits=INPUT_BITS):
    thresh = float(2 ** (bits - 1) - 1)
    xs = thresh / x_thresh
    ys = thresh / y_thresh
    xq = jnp.clip(jnp.round(x * xs), -thresh, thresh) / xs
    yq = jnp.clip(jnp.round(y * ys), -thresh, thresh) / ys
    return jnp.matmul(xq, yq)


if __name__ == "__main__":
    key = jax.random.PRNGKey(0)
    kx, ky = jax.random.split(key)

    M, K, N = 8, 32, 16  # small shapes: seq=8, hidden=32, out=16
    x = jax.random.normal(kx, (M, K), dtype=jnp.float32)
    y = jax.random.normal(ky, (K, N), dtype=jnp.float32)

    # Deterministic threshold buffers: first EMA fill => abs().max() of inputs.
    x_thresh = jnp.max(jnp.abs(x)).reshape(1).astype(jnp.float32)
    y_thresh = jnp.max(jnp.abs(y)).reshape(1).astype(jnp.float32)

    out = quantized_matmul(x, y, x_thresh, y_thresh)
    out = jax.block_until_ready(out)

    ref = _reference(x, y, x_thresh, y_thresh)
    assert out.shape == (M, N)
    err = float(jnp.max(jnp.abs(out - ref)))
    assert jnp.allclose(out, ref, atol=1e-4, rtol=1e-4), f"max abs err = {err}"
    print("KERNEL_OK")
</pallas_src>

<mosaic_0001>
module attributes {stable_mosaic.version = 11 : i64} {
  func.func @_prequant_kernel(%arg0: i32, %arg1: i32, %arg2: memref<1xf32, #tpu.memory_space<smem>>, %arg3: memref<32x128xf32, #tpu.memory_space<vmem>>, %arg4: memref<32x128xbf16, #tpu.memory_space<vmem>>) attributes {dimension_semantics = [#tpu.dimension_semantics<parallel>, #tpu.dimension_semantics<parallel>], iteration_bounds = array<i64: 1, 1>, scalar_prefetch = 0 : i64, scratch_operands = 0 : i64, tpu.core_type = #tpu.core_type<tc>, window_params = [{transform_indices = @transform_0, window_bounds = array<i64: 1>}, {transform_indices = @transform_1, window_bounds = array<i64: 32, 128>}, {transform_indices = @transform_2, window_bounds = array<i64: 32, 128>}]} {
    %c0 = arith.constant 0 : index
    %c0_0 = arith.constant 0 : index
    %0 = vector.load %arg3[%c0, %c0_0] : memref<32x128xf32, #tpu.memory_space<vmem>>, vector<32x128xf32>
    %c0_1 = arith.constant 0 : index
    %1 = memref.load %arg2[%c0_1] : memref<1xf32, #tpu.memory_space<smem>>
    %2 = vector.broadcast %1 : f32 to vector<32x128xf32>
    %3 = arith.mulf %0, %2 : vector<32x128xf32>
    %4 = math.roundeven %3 : vector<32x128xf32>
    %cst = arith.constant -1.270000e+02 : f32
    %cst_2 = arith.constant 1.270000e+02 : f32
    %5 = vector.broadcast %cst : f32 to vector<32x128xf32>
    %6 = arith.maximumf %5, %4 : vector<32x128xf32>
    %7 = vector.broadcast %cst_2 : f32 to vector<32x128xf32>
    %8 = arith.minimumf %7, %6 : vector<32x128xf32>
    %c32_i32 = arith.constant 32 : i32
    %9 = arith.muli %arg0, %c32_i32 : i32
    %10 = tpu.iota {dimensions = array<i32: 0>} : vector<32x128xi32>
    %11 = vector.broadcast %9 : i32 to vector<32x128xi32>
    %12 = arith.addi %11, %10 : vector<32x128xi32>
    %c128_i32 = arith.constant 128 : i32
    %13 = arith.muli %arg1, %c128_i32 : i32
    %14 = tpu.iota {dimensions = array<i32: 1>} : vector<32x128xi32>
    %15 = vector.broadcast %13 : i32 to vector<32x128xi32>
    %16 = arith.addi %15, %14 : vector<32x128xi32>
    %c8_i32 = arith.constant 8 : i32
    %17 = vector.broadcast %c8_i32 : i32 to vector<32x128xi32>
    %18 = arith.cmpi slt, %12, %17 : vector<32x128xi32>
    %c32_i32_3 = arith.constant 32 : i32
    %19 = vector.broadcast %c32_i32_3 : i32 to vector<32x128xi32>
    %20 = arith.cmpi slt, %16, %19 : vector<32x128xi32>
    %21 = arith.andi %18, %20 : vector<32x128xi1>
    %cst_4 = arith.constant 0.000000e+00 : f32
    %22 = vector.broadcast %cst_4 : f32 to vector<32x128xf32>
    %23 = arith.select %21, %8, %22 : vector<32x128xi1>, vector<32x128xf32>
    %24 = arith.truncf %23 : vector<32x128xf32> to vector<32x128xbf16>
    %c0_5 = arith.constant 0 : index
    %c0_6 = arith.constant 0 : index
    %25 = vector.load %arg4[%c0_5, %c0_6] : memref<32x128xbf16, #tpu.memory_space<vmem>>, vector<32x128xbf16>
    tpu.vector_store %arg4[%c0_5, %c0_6], %24 {strides = array<i32>} : memref<32x128xbf16, #tpu.memory_space<vmem>>, vector<32x128xbf16>,
    return
  }
  func.func @transform_0(%arg0: i32, %arg1: i32) -> i32 {
    %c0_i32 = arith.constant 0 : i32
    %c0_i32_0 = arith.constant 0 : i32
    return %c0_i32 : i32
  }
  func.func @transform_1(%arg0: i32, %arg1: i32) -> (i32, i32) {
    %c0_i32 = arith.constant 0 : i32
    return %arg0, %arg1 : i32, i32
  }
  func.func @transform_2(%arg0: i32, %arg1: i32) -> (i32, i32) {
    %c0_i32 = arith.constant 0 : i32
    return %arg0, %arg1 : i32, i32
  }
}

</mosaic_0001>

<bundles_post_ra>
// kernel: tpu_custom_call.1
= control target key start
LH: loop header
LB: loop body
LE: loop exit
PB: predicated region body
PF: predicated region fallthrough
CT: control target
= control target key end

     0   :  { %8 = vsyncpa [#allocation4], 0  ;;  %s220_s0 = inlined_call_operand.<no memory space> [shape: f32[1], index: 0, kind: input, shape index: {}]   ;;  %s221_s1 = inlined_call_operand.hbm [shape: f32[8,32], index: 1, kind: input, shape index: {}]   ;;  %s222_s2 = inlined_call_operand.hbm [shape: bf16[32,128], index: 2, kind: output, shape index: {}]  }
   0x1   :  { %9 = vsyncpa [#allocation5], 0 }
   0x2   :  { %15 = vsyncadd [#allocation4], 384  ;;  %s16_s11 = sshll.u32 %s221_s1, 4  ;;  %s189_s12 = smov [#allocation3]   ;;  %s17_s11 = int_to_ptr.hbm [resolvable:$true] %s16_s11 }
   0x3   :  { %s18_s13 = sshll.u32 %s189_s12, 4  ;;  %s190_s14 = smov 128   ;;  %s19_s13 = int_to_ptr.vmem [resolvable:$true] %s18_s13 }
   0x4   :  { %s191_s15 = smov 8  }
   0x5   :  { %24 = dma.hbm_to_vmem [thread:$0]  %s17_s11, 128, %s19_s13, [#allocation4], %s190_s14, %s190_s14, %s191_s15  }
   0x6   :  { %185 = dma.done.wait [#allocation4], 512  }
   0x7   :  { %186 = vsyncadd [#allocation4], 4294966784  ;;  %v192_v0 = vmov 0.0|0.0   ;;  %v34_v3 = vstv %s220_s0  ;;  %v29_v4 = vld [vmem:[#allocation3] sm:$0xff]  ;;  %v63_v7 = vlaneseq  ;;  %s193_s1 = smov [#allocation6]   ;;  %s94_s0 = sshll.u32 %s222_s2, 4  ;;  %s95_s0 = int_to_ptr.hbm [resolvable:$true] %s94_s0 }
   0x8   :  { %v113_v1 = vunpack.c.l.bf16 %v192_v0  ;;  %v35_v5 = vmul.f32 %v34_v3, %v29_v4  ;;  %s92_s18 = sshll.u32 %s193_s1, 4  ;;  %s194_s21 = smov 64   ;;  %s93_s18 = int_to_ptr.vmem [resolvable:$true] %s92_s18 }
   0x9   :  { %v64_v12 = vand.u32 127, %v63_v7  ;;  %s195_s22 = smov 4  }
   0xa   :  { %v119_v2 = vpack.c.bf16 %v113_v1, %v113_v1  ;;  %v124_v6 = vcvt.f32.s32 %v35_v5  ;;  %v122_v8 = vand.u32 2147483647, %v35_v5  ;;  %v127_v10 = vand.u32 2147483648, %v35_v5 }
   0xb   :  { %vm71_vm1 = vcmp.lt.s32.totalorder %v64_v12, 32 }
   0xc   :  { %121 = vst [vmem:[#allocation6 + $0x8] sm:$0xff] %v119_v2   ;;  %v125_v9 = vcvt.s32.f32 %v124_v6  ;;  %vm123_vm0 = vcmp.lt.f32.partialorder %v122_v8, 8388608.0 }
   0xe   :  { %v126_v11 = vand.u32 2147483647, %v125_v9 }
  0x10   :  { %v128_v13 = vor.u32 %v127_v10, %v126_v11 }
  0x12   :  { %v129_v14 = vsel %vm123_vm0, %v128_v13, %v35_v5 }
  0x13   :  { %v107_v15 = vclamps-f32 %v129_v14, 127.0 }
  0x15   :  { %v76_v16 = vsel %vm71_vm1, %v107_v15, 0.0 }
  0x16   :  { %v114_v17 = vpack.c.bf16 %v113_v1, %v76_v16 }
  0x18   :  { %115 = vst [vmem:[#allocation6] sm:$0xff] %v114_v17  }
  0x19   :  { %100 = dma.vmem_to_hbm [thread:$0]  %s93_s18, 256, %s95_s0, [#allocation5], %s194_s21, %s194_s21, %s195_s22  }
  0x1a   :  { %187 = dma.done.wait [#allocation5], 256  }
  0x1b   :  { %188 = vsyncadd [#allocation5], 4294967040 }
  0x1c   :  { %105 = vsyncpa [#allocation4], 1 }
  0x1d   :  { %106 = vsyncpa [#allocation5], 1 }

</bundles_post_ra>
